<compile_context>
chip_gen: v6e
topology: v6e:2x2x1
jax: 0.10.0
libtpu: 0.0.40
codegen_flags: <defaults>
</compile_context>

<pallas_src>
import jax
import jax.numpy as jnp
from jax.experimental import pallas as pl
from jax.experimental.pallas import tpu as pltpu

_C1 = 0.01 ** 2
_C2 = 0.03 ** 2


def _pool3_valid(a):
    """3x3 box mean, stride 1, VALID padding, over the last two dims (separable)."""
    h, w = a.shape[-2], a.shape[-1]
    rows = a[..., 0:h - 2, :] + a[..., 1:h - 1, :] + a[..., 2:h, :]
    out = rows[..., 0:w - 2] + rows[..., 1:w - 1] + rows[..., 2:w]
    return out * (1.0 / 9.0)


def _ssim_kernel(x_ref, y_ref, o_ref):
    # x_ref / y_ref: (NB, H, W) block of flattened (N*C, H, W) inputs.
    x = x_ref[...].astype(jnp.float32)
    y = y_ref[...].astype(jnp.float32)

    mu_x = _pool3_valid(x)
    mu_y = _pool3_valid(y)
    mu_xy = mu_x * mu_y
    mu_x2 = mu_x * mu_x
    mu_y2 = mu_y * mu_y

    sigma_x = _pool3_valid(x * x) - mu_x2
    sigma_y = _pool3_valid(y * y) - mu_y2
    sigma_xy = _pool3_valid(x * y) - mu_xy

    ssim_n = (2.0 * mu_xy + _C1) * (2.0 * sigma_xy + _C2)
    ssim_d = (mu_x2 + mu_y2 + _C1) * (sigma_x + sigma_y + _C2)
    ssim = ssim_n / ssim_d

    o_ref[...] = jnp.clip((1.0 - ssim) * 0.5, 0.0, 1.0).astype(o_ref.dtype)


def _choose_block_images(nc, h, w, itemsize, budget_bytes=2 << 20):
    """Largest divisor of nc whose input block fits the budget; keep >=2 grid steps
    when possible so the 'parallel' axis can shard across v7x's two TensorCores."""
    max_nb = max(1, budget_bytes // max(1, h * w * itemsize))
    if nc > 1:
        max_nb = min(max_nb, (nc + 1) // 2)
    nb = 1
    for d in range(1, nc + 1):
        if nc % d == 0 and d <= max_nb:
            nb = d
    return nb


def ssim_loss(x, y):
    """x, y: (N, C, H, W). Returns clamp((1-SSIM)/2, 0, 1) of shape (N, C, H-2, W-2)."""
    assert x.ndim == 4 and y.ndim == 4 and x.shape == y.shape
    n, c, h, w = x.shape
    assert h >= 3 and w >= 3, "SSIM 3x3 window needs H, W >= 3"

    nc = n * c
    xi = x.reshape(nc, h, w)
    yi = y.reshape(nc, h, w)

    nb = _choose_block_images(nc, h, w, x.dtype.itemsize)
    grid = (nc // nb,)

    # TODO(synk): for very large H*W a single (nb, H, W) block can exceed v7x's
    # 64 MiB VMEM; that case needs row tiling with a 2-row halo (overlapping
    # blocks), which is not implemented here.
    grid_spec = pltpu.PrefetchScalarGridSpec(
        num_scalar_prefetch=0,
        grid=grid,
        in_specs=[
            pl.BlockSpec((nb, h, w), lambda i: (i, 0, 0)),
            pl.BlockSpec((nb, h, w), lambda i: (i, 0, 0)),
        ],
        out_specs=pl.BlockSpec((nb, h - 2, w - 2), lambda i: (i, 0, 0)),
    )

    out = pl.pallas_call(
        _ssim_kernel,
        grid_spec=grid_spec,
        out_shape=jax.ShapeDtypeStruct((nc, h - 2, w - 2), x.dtype),
        compiler_params=pltpu.CompilerParams(
            dimension_semantics=("parallel",),
            vmem_limit_bytes=64 * 1024 * 1024,
        ),
    )(xi, yi)

    return out.reshape(n, c, h - 2, w - 2)


def _ssim_loss_ref(x, y):
    """Independent pure-JAX reference (reduce_window based AvgPool2d(3, 1))."""
    def pool(a):
        s = jax.lax.reduce_window(
            a, 0.0, jax.lax.add,
            window_dimensions=(1, 1, 3, 3),
            window_strides=(1, 1, 1, 1),
            padding="VALID",
        )
        return s / 9.0

    mu_x = pool(x)
    mu_y = pool(y)
    mu_xy = mu_x * mu_y
    mu_x2 = mu_x ** 2
    mu_y2 = mu_y ** 2
    sigma_x = pool(x * x) - mu_x2
    sigma_y = pool(y * y) - mu_y2
    sigma_xy = pool(x * y) - mu_xy
    ssim_n = (2.0 * mu_xy + _C1) * (2.0 * sigma_xy + _C2)
    ssim_d = (mu_x2 + mu_y2 + _C1) * (sigma_x + sigma_y + _C2)
    return jnp.clip((1.0 - ssim_n / ssim_d) * 0.5, 0.0, 1.0)


if __name__ == "__main__":
    key = jax.random.PRNGKey(0)
    k1, k2 = jax.random.split(key, 2)

    N, C, H, W = 2, 4, 16, 16
    x = jax.random.uniform(k1, (N, C, H, W), dtype=jnp.float32)
    y = jax.random.uniform(k2, (N, C, H, W), dtype=jnp.float32)

    out = ssim_loss(x, y)
    out = jax.block_until_ready(out)

    ref = _ssim_loss_ref(x, y)
    assert out.shape == ref.shape == (N, C, H - 2, W - 2), (out.shape, ref.shape)
    assert jnp.allclose(out, ref, rtol=1e-4, atol=1e-4), (
        float(jnp.max(jnp.abs(out - ref))))

    print("KERNEL_OK")
</pallas_src>

<mosaic_0001>
module attributes {stable_mosaic.version = 11 : i64} {
  func.func @_ssim_kernel(%arg0: i32, %arg1: memref<4x16x16xf32, #tpu.memory_space<vmem>>, %arg2: memref<4x16x16xf32, #tpu.memory_space<vmem>>, %arg3: memref<4x14x14xf32, #tpu.memory_space<vmem>>) attributes {dimension_semantics = [#tpu.dimension_semantics<parallel>], iteration_bounds = array<i64: 2>, scalar_prefetch = 0 : i64, scratch_operands = 0 : i64, tpu.core_type = #tpu.core_type<tc>, window_params = [{transform_indices = @transform_0, window_bounds = array<i64: 4, 16, 16>}, {transform_indices = @transform_1, window_bounds = array<i64: 4, 16, 16>}, {transform_indices = @transform_2, window_bounds = array<i64: 4, 14, 14>}]} {
    %c0 = arith.constant 0 : index
    %c0_0 = arith.constant 0 : index
    %c0_1 = arith.constant 0 : index
    %0 = vector.load %arg1[%c0, %c0_0, %c0_1] : memref<4x16x16xf32, #tpu.memory_space<vmem>>, vector<4x16x16xf32>
    %c0_2 = arith.constant 0 : index
    %c0_3 = arith.constant 0 : index
    %c0_4 = arith.constant 0 : index
    %1 = vector.load %arg2[%c0_2, %c0_3, %c0_4] : memref<4x16x16xf32, #tpu.memory_space<vmem>>, vector<4x16x16xf32>
    %2 = vector.extract_strided_slice %0 {offsets = [0, 0, 0], sizes = [4, 14, 16], strides = [1, 1, 1]} : vector<4x16x16xf32> to vector<4x14x16xf32>
    %3 = vector.extract_strided_slice %0 {offsets = [0, 1, 0], sizes = [4, 14, 16], strides = [1, 1, 1]} : vector<4x16x16xf32> to vector<4x14x16xf32>
    %4 = arith.addf %2, %3 : vector<4x14x16xf32>
    %5 = vector.extract_strided_slice %0 {offsets = [0, 2, 0], sizes = [4, 14, 16], strides = [1, 1, 1]} : vector<4x16x16xf32> to vector<4x14x16xf32>
    %6 = arith.addf %4, %5 : vector<4x14x16xf32>
    %7 = vector.extract_strided_slice %6 {offsets = [0, 0, 0], sizes = [4, 14, 14], strides = [1, 1, 1]} : vector<4x14x16xf32> to vector<4x14x14xf32>
    %8 = vector.extract_strided_slice %6 {offsets = [0, 0, 1], sizes = [4, 14, 14], strides = [1, 1, 1]} : vector<4x14x16xf32> to vector<4x14x14xf32>
    %9 = arith.addf %7, %8 : vector<4x14x14xf32>
    %10 = vector.extract_strided_slice %6 {offsets = [0, 0, 2], sizes = [4, 14, 14], strides = [1, 1, 1]} : vector<4x14x16xf32> to vector<4x14x14xf32>
    %11 = arith.addf %9, %10 : vector<4x14x14xf32>
    %cst = arith.constant 0.111111112 : f32
    %12 = vector.broadcast %cst : f32 to vector<4x14x14xf32>
    %13 = arith.mulf %11, %12 : vector<4x14x14xf32>
    %14 = vector.extract_strided_slice %1 {offsets = [0, 0, 0], sizes = [4, 14, 16], strides = [1, 1, 1]} : vector<4x16x16xf32> to vector<4x14x16xf32>
    %15 = vector.extract_strided_slice %1 {offsets = [0, 1, 0], sizes = [4, 14, 16], strides = [1, 1, 1]} : vector<4x16x16xf32> to vector<4x14x16xf32>
    %16 = arith.addf %14, %15 : vector<4x14x16xf32>
    %17 = vector.extract_strided_slice %1 {offsets = [0, 2, 0], sizes = [4, 14, 16], strides = [1, 1, 1]} : vector<4x16x16xf32> to vector<4x14x16xf32>
    %18 = arith.addf %16, %17 : vector<4x14x16xf32>
    %19 = vector.extract_strided_slice %18 {offsets = [0, 0, 0], sizes = [4, 14, 14], strides = [1, 1, 1]} : vector<4x14x16xf32> to vector<4x14x14xf32>
    %20 = vector.extract_strided_slice %18 {offsets = [0, 0, 1], sizes = [4, 14, 14], strides = [1, 1, 1]} : vector<4x14x16xf32> to vector<4x14x14xf32>
    %21 = arith.addf %19, %20 : vector<4x14x14xf32>
    %22 = vector.extract_strided_slice %18 {offsets = [0, 0, 2], sizes = [4, 14, 14], strides = [1, 1, 1]} : vector<4x14x16xf32> to vector<4x14x14xf32>
    %23 = arith.addf %21, %22 : vector<4x14x14xf32>
    %cst_5 = arith.constant 0.111111112 : f32
    %24 = vector.broadcast %cst_5 : f32 to vector<4x14x14xf32>
    %25 = arith.mulf %23, %24 : vector<4x14x14xf32>
    %26 = arith.mulf %13, %25 : vector<4x14x14xf32>
    %27 = arith.mulf %13, %13 : vector<4x14x14xf32>
    %28 = arith.mulf %25, %25 : vector<4x14x14xf32>
    %29 = arith.mulf %0, %0 : vector<4x16x16xf32>
    %30 = vector.extract_strided_slice %29 {offsets = [0, 0, 0], sizes = [4, 14, 16], strides = [1, 1, 1]} : vector<4x16x16xf32> to vector<4x14x16xf32>
    %31 = vector.extract_strided_slice %29 {offsets = [0, 1, 0], sizes = [4, 14, 16], strides = [1, 1, 1]} : vector<4x16x16xf32> to vector<4x14x16xf32>
    %32 = arith.addf %30, %31 : vector<4x14x16xf32>
    %33 = vector.extract_strided_slice %29 {offsets = [0, 2, 0], sizes = [4, 14, 16], strides = [1, 1, 1]} : vector<4x16x16xf32> to vector<4x14x16xf32>
    %34 = arith.addf %32, %33 : vector<4x14x16xf32>
    %35 = vector.extract_strided_slice %34 {offsets = [0, 0, 0], sizes = [4, 14, 14], strides = [1, 1, 1]} : vector<4x14x16xf32> to vector<4x14x14xf32>
    %36 = vector.extract_strided_slice %34 {offsets = [0, 0, 1], sizes = [4, 14, 14], strides = [1, 1, 1]} : vector<4x14x16xf32> to vector<4x14x14xf32>
    %37 = arith.addf %35, %36 : vector<4x14x14xf32>
    %38 = vector.extract_strided_slice %34 {offsets = [0, 0, 2], sizes = [4, 14, 14], strides = [1, 1, 1]} : vector<4x14x16xf32> to vector<4x14x14xf32>
    %39 = arith.addf %37, %38 : vector<4x14x14xf32>
    %cst_6 = arith.constant 0.111111112 : f32
    %40 = vector.broadcast %cst_6 : f32 to vector<4x14x14xf32>
    %41 = arith.mulf %39, %40 : vector<4x14x14xf32>
    %42 = arith.subf %41, %27 : vector<4x14x14xf32>
    %43 = arith.mulf %1, %1 : vector<4x16x16xf32>
    %44 = vector.extract_strided_slice %43 {offsets = [0, 0, 0], sizes = [4, 14, 16], strides = [1, 1, 1]} : vector<4x16x16xf32> to vector<4x14x16xf32>
    %45 = vector.extract_strided_slice %43 {offsets = [0, 1, 0], sizes = [4, 14, 16], strides = [1, 1, 1]} : vector<4x16x16xf32> to vector<4x14x16xf32>
    %46 = arith.addf %44, %45 : vector<4x14x16xf32>
    %47 = vector.extract_strided_slice %43 {offsets = [0, 2, 0], sizes = [4, 14, 16], strides = [1, 1, 1]} : vector<4x16x16xf32> to vector<4x14x16xf32>
    %48 = arith.addf %46, %47 : vector<4x14x16xf32>
    %49 = vector.extract_strided_slice %48 {offsets = [0, 0, 0], sizes = [4, 14, 14], strides = [1, 1, 1]} : vector<4x14x16xf32> to vector<4x14x14xf32>
    %50 = vector.extract_strided_slice %48 {offsets = [0, 0, 1], sizes = [4, 14, 14], strides = [1, 1, 1]} : vector<4x14x16xf32> to vector<4x14x14xf32>
    %51 = arith.addf %49, %50 : vector<4x14x14xf32>
    %52 = vector.extract_strided_slice %48 {offsets = [0, 0, 2], sizes = [4, 14, 14], strides = [1, 1, 1]} : vector<4x14x16xf32> to vector<4x14x14xf32>
    %53 = arith.addf %51, %52 : vector<4x14x14xf32>
    %cst_7 = arith.constant 0.111111112 : f32
    %54 = vector.broadcast %cst_7 : f32 to vector<4x14x14xf32>
    %55 = arith.mulf %53, %54 : vector<4x14x14xf32>
    %56 = arith.subf %55, %28 : vector<4x14x14xf32>
    %57 = arith.mulf %0, %1 : vector<4x16x16xf32>
    %58 = vector.extract_strided_slice %57 {offsets = [0, 0, 0], sizes = [4, 14, 16], strides = [1, 1, 1]} : vector<4x16x16xf32> to vector<4x14x16xf32>
    %59 = vector.extract_strided_slice %57 {offsets = [0, 1, 0], sizes = [4, 14, 16], strides = [1, 1, 1]} : vector<4x16x16xf32> to vector<4x14x16xf32>
    %60 = arith.addf %58, %59 : vector<4x14x16xf32>
    %61 = vector.extract_strided_slice %57 {offsets = [0, 2, 0], sizes = [4, 14, 16], strides = [1, 1, 1]} : vector<4x16x16xf32> to vector<4x14x16xf32>
    %62 = arith.addf %60, %61 : vector<4x14x16xf32>
    %63 = vector.extract_strided_slice %62 {offsets = [0, 0, 0], sizes = [4, 14, 14], strides = [1, 1, 1]} : vector<4x14x16xf32> to vector<4x14x14xf32>
    %64 = vector.extract_strided_slice %62 {offsets = [0, 0, 1], sizes = [4, 14, 14], strides = [1, 1, 1]} : vector<4x14x16xf32> to vector<4x14x14xf32>
    %65 = arith.addf %63, %64 : vector<4x14x14xf32>
    %66 = vector.extract_strided_slice %62 {offsets = [0, 0, 2], sizes = [4, 14, 14], strides = [1, 1, 1]} : vector<4x14x16xf32> to vector<4x14x14xf32>
    %67 = arith.addf %65, %66 : vector<4x14x14xf32>
    %cst_8 = arith.constant 0.111111112 : f32
    %68 = vector.broadcast %cst_8 : f32 to vector<4x14x14xf32>
    %69 = arith.mulf %67, %68 : vector<4x14x14xf32>
    %70 = arith.subf %69, %26 : vector<4x14x14xf32>
    %cst_9 = arith.constant 2.000000e+00 : f32
    %71 = vector.broadcast %cst_9 : f32 to vector<4x14x14xf32>
    %72 = arith.mulf %71, %26 : vector<4x14x14xf32>
    %cst_10 = arith.constant 9.99999974E-5 : f32
    %73 = vector.broadcast %cst_10 : f32 to vector<4x14x14xf32>
    %74 = arith.addf %72, %73 : vector<4x14x14xf32>
    %cst_11 = arith.constant 2.000000e+00 : f32
    %75 = vector.broadcast %cst_11 : f32 to vector<4x14x14xf32>
    %76 = arith.mulf %75, %70 : vector<4x14x14xf32>
    %cst_12 = arith.constant 8.99999984E-4 : f32
    %77 = vector.broadcast %cst_12 : f32 to vector<4x14x14xf32>
    %78 = arith.addf %76, %77 : vector<4x14x14xf32>
    %79 = arith.mulf %74, %78 : vector<4x14x14xf32>
    %80 = arith.addf %27, %28 : vector<4x14x14xf32>
    %cst_13 = arith.constant 9.99999974E-5 : f32
    %81 = vector.broadcast %cst_13 : f32 to vector<4x14x14xf32>
    %82 = arith.addf %80, %81 : vector<4x14x14xf32>
    %83 = arith.addf %42, %56 : vector<4x14x14xf32>
    %cst_14 = arith.constant 8.99999984E-4 : f32
    %84 = vector.broadcast %cst_14 : f32 to vector<4x14x14xf32>
    %85 = arith.addf %83, %84 : vector<4x14x14xf32>
    %86 = arith.mulf %82, %85 : vector<4x14x14xf32>
    %87 = arith.divf %79, %86 : vector<4x14x14xf32>
    %cst_15 = arith.constant 1.000000e+00 : f32
    %88 = vector.broadcast %cst_15 : f32 to vector<4x14x14xf32>
    %89 = arith.subf %88, %87 : vector<4x14x14xf32>
    %cst_16 = arith.constant 5.000000e-01 : f32
    %90 = vector.broadcast %cst_16 : f32 to vector<4x14x14xf32>
    %91 = arith.mulf %89, %90 : vector<4x14x14xf32>
    %cst_17 = arith.constant 0.000000e+00 : f32
    %cst_18 = arith.constant 1.000000e+00 : f32
    %92 = vector.broadcast %cst_17 : f32 to vector<4x14x14xf32>
    %93 = arith.maximumf %92, %91 : vector<4x14x14xf32>
    %94 = vector.broadcast %cst_18 : f32 to vector<4x14x14xf32>
    %95 = arith.minimumf %94, %93 : vector<4x14x14xf32>
    %c0_19 = arith.constant 0 : index
    %c0_20 = arith.constant 0 : index
    %c0_21 = arith.constant 0 : index
    %96 = vector.load %arg3[%c0_19, %c0_20, %c0_21] : memref<4x14x14xf32, #tpu.memory_space<vmem>>, vector<4x14x14xf32>
    tpu.vector_store %arg3[%c0_19, %c0_20, %c0_21], %95 {strides = array<i32>} : memref<4x14x14xf32, #tpu.memory_space<vmem>>, vector<4x14x14xf32>,
    return
  }
  func.func @transform_0(%arg0: i32) -> (i32, i32, i32) {
    %c0_i32 = arith.constant 0 : i32
    %c0_i32_0 = arith.constant 0 : i32
    %c0_i32_1 = arith.constant 0 : i32
    return %arg0, %c0_i32, %c0_i32_0 : i32, i32, i32
  }
  func.func @transform_1(%arg0: i32) -> (i32, i32, i32) {
    %c0_i32 = arith.constant 0 : i32
    %c0_i32_0 = arith.constant 0 : i32
    %c0_i32_1 = arith.constant 0 : i32
    return %arg0, %c0_i32, %c0_i32_0 : i32, i32, i32
  }
  func.func @transform_2(%arg0: i32) -> (i32, i32, i32) {
    %c0_i32 = arith.constant 0 : i32
    %c0_i32_0 = arith.constant 0 : i32
    %c0_i32_1 = arith.constant 0 : i32
    return %arg0, %c0_i32, %c0_i32_0 : i32, i32, i32
  }
}

</mosaic_0001>

<bundles_post_ra>
// kernel: tpu_custom_call.1
= control target key start
LH: loop header
LB: loop body
LE: loop exit
PB: predicated region body
PF: predicated region fallthrough
CT: control target
= control target key end

     0   :  { %7 = vsyncpa [#allocation3], 0  ;;  %s2427_s0 = inlined_call_operand.hbm [shape: f32[8,16,16], index: 0, kind: input, shape index: {}]   ;;  %s2428_s1 = inlined_call_operand.hbm [shape: f32[8,16,16], index: 1, kind: input, shape index: {}]   ;;  %s2429_s2 = inlined_call_operand.vmem [shape: f32[8,14,14], index: 2, kind: output, shape index: {}]  }
   0x1   :  { %9 = vsyncpa [#allocation3 + $0x1], 0 }
   0x2   :  { %10 = vsyncpa [#allocation5], 0 }
   0x3   :  { %12 = vsyncpa [#allocation5 + $0x1], 0  ;;  %s1457_s9 = smov 0   ;;  %s1459_s10 = smov 0  }
   0x4   :  { %s1461_s11 = smov 0   ;;  %s1463_s12 = smov 0  }
   0x5 LB: > { %s1251_s13 = sadd.s32 4294967295, %s1434_s12   ;;  %s1477_s14 = sadd.s32 1, %s1434_s12   ;;  %s1434_s12 = sphi %s1463_s12, %s2512_s12   ;;  %s1430_s11 = sphi %s1461_s11, %s2511_s11   ;;  %s1426_s10 = sphi %s1459_s10, %s2510_s10   ;;  %s1422_s9 = sphi %s1457_s9, %s2509_s9  }
   0x6   : > { %s22_s15 = ssub.s32 %s1434_s12, %s1477_s14  ;;  %s25_s16 = sadd.s32 1, %s1430_s11 }
   0x7   : > { %p23_p0 = scmp.eq.s32.totalorder %s22_s15, 0  ;;  %p32_p1 = scmp.ne.s32.totalorder %s1430_s11, %s1426_s10 }
   0x8   : > { %p33_p2 = scmp.eq.s32.totalorder %s1434_s12, 0  ;;  %p38_p3 = scmp.ne.s32.totalorder %s1426_s10, %s1422_s9 }
   0x9   : > { %s1487_s17 = scalar_select %p23_p0, %s1430_s11, %s25_s16  }
   0xa   : > { %p34_p4 = por %p33_p2, %p32_p1  ;;  %p39_p5 = scmp.eq.s32.totalorder %s1251_s13, 0 }
   0xb   : > { %p1287_p6 = scmp.lt.s32.totalorder %s1434_s12, 2  ;;  %s1497_s19 = sand.u32 1, %s1430_s11  }
   0xc   : > { %p1492_p7 = por %p39_p5, %p38_p3  ;;  %s1255_s20 = sshll.u32 %s1497_s19, 6 }
   0xd   : > { %s1272_s21 = sshll.u32 %s1434_s12, 10  ;;  %s118_s25 = scalar_lea.vmem [#allocation2], %s1255_s20 }
   0xe   : > { %s2457_s18 = scalar_select %p1492_p7, 1, 0 }
   0xf   : > { %s1506_s24 = scalar_lea.hbm %s2427_s0, %s1272_s21  ;;  %s126_s26 = sshll.u32 %s118_s25, 4  ;;  %s1510_s26 = int_to_ptr.vmem [resolvable:$true] %s126_s26 }
  0x10   : > { %p1512_p8 = pnand %p1287_p6, %p34_p4  ;;  %s115_s28 = scalar_lea.sflag [#allocation3], %s1497_s19 }
  0x11   : > { %s1340_s29 = scalar_lea.hbm %s1506_s24, 1024  ;;  %s1345_s4 = scalar_lea.hbm %s2427_s0, 2048 }
  0x12   : > { %p1341_p10 = scmp.ne.s32.totalorder %s1506_s24, %s1340_s29  ;;  %p1342_p11 = pneg %p1512_p8 }
  0x13   : > { %p1346_p0 = scmp.lt.s32.totalorder %s1506_s24, %s2427_s0  ;;  %p1347_p1 = scmp.lt.s32.totalorder %s1345_s4, %s1340_s29 }
  0x14   : > { %p1343_p12 = pnand %p1342_p11, %p1341_p10 }
  0x15   : > { %p1348_p2 = por %p1347_p1, %p1346_p0 }
  0x16   : > { %p1344_p13 = pneg %p1343_p12 }
  0x18   : > { %p1349_p3 = pnand %p1348_p2, %p1344_p13 }
  0x1a   : > { %1352 = shalt.err (!%p1349_p3)
}
  0x1b   : > { %s1353_s7 = scalar_lea.vmem %s1510_s26, 1024  ;;  %s1436_s8 = smov [#allocation2]  }
  0x1c   : > { %p1354_p4 = scmp.ne.s32.totalorder %s1510_s26, %s1353_s7  ;;  %s1358_s9 = sshll.u32 %s1436_s8, 4  ;;  %s1359_s9 = int_to_ptr.vmem [resolvable:$false] %s1358_s9 }
  0x1d   : > { %s1360_s15 = scalar_lea.vmem %s1359_s9, 2048  ;;  %p1361_p10 = scmp.lt.s32.totalorder %s1510_s26, %s1359_s9 }
  0x1e   : > { %p1356_p5 = pnand %p1354_p4, %p1342_p11  ;;  %p1362_p12 = scmp.lt.s32.totalorder %s1360_s15, %s1353_s7 }
  0x20   : > { %p1357_p6 = pneg %p1356_p5  ;;  %p1363_p9 = por %p1362_p12, %p1361_p10 }
  0x22   : > { %p1364_p0 = pnand %p1363_p9, %p1357_p6 }
  0x24   : > { %1367 = shalt.err (!%p1364_p0)
}
  0x25   : > { %s1437_s16 = smov 128   ;;  %s1438_s22 = smov 8  }
  0x26   : > { %1283 = dma.hbm_to_vmem [thread:$0]  (!%p1512_p8), %s1506_s24, 1024, %s1510_s26, %s115_s28, %s1437_s16, %s1437_s16, %s1438_s22  }
  0x27   : > { %p156_p9 = scmp.lt.s32.totalorder %s1434_s12, 3  ;;  %s1553_s29 = scalar_lea.hbm %s2428_s1, %s1272_s21 }
  0x28   : > { %p2459_p13 = scmp.ge.s32.totalorder %s1434_s12, 1  ;;  %s140_s3 = scalar_lea.vmem [#allocation4], %s1255_s20 }
  0x29   : > { %s148_s4 = sshll.u32 %s140_s3, 4  ;;  %s137_s24 = scalar_lea.sflag [#allocation5], %s1497_s19  ;;  %s1563_s4 = int_to_ptr.vmem [resolvable:$true] %s148_s4 }
  0x2a   : > { %p1557_p1 = pnand %p2459_p13, %p156_p9  ;;  %s1368_s26 = scalar_lea.hbm %s1553_s29, 1024 }
  0x2b   : > { %p1369_p2 = scmp.ne.s32.totalorder %s1553_s29, %s1368_s26  ;;  %s1373_s5 = scalar_lea.hbm %s2428_s1, 2048 }
  0x2c   : > { %p1374_p5 = scmp.lt.s32.totalorder %s1553_s29, %s2428_s1  ;;  %p1375_p6 = scmp.lt.s32.totalorder %s1373_s5, %s1368_s26 }
  0x2d   : > { %p1371_p3 = pnand %p1369_p2, %p1342_p11 }
  0x2e   : > { %p1376_p10 = por %p1375_p6, %p1374_p5 }
  0x2f   : > { %p1372_p4 = pneg %p1371_p3 }
  0x31   : > { %p1377_p12 = pnand %p1376_p10, %p1372_p4 }
  0x33   : > { %1380 = shalt.err (!%p1377_p12)
}
  0x34   : > { %s1381_s19 = scalar_lea.vmem %s1563_s4, 1024  ;;  %s1439_s20 = smov [#allocation4]  }
  0x35   : > { %p1382_p0 = scmp.ne.s32.totalorder %s1563_s4, %s1381_s19  ;;  %s1386_s8 = sshll.u32 %s1439_s20, 4  ;;  %s1387_s8 = int_to_ptr.vmem [resolvable:$false] %s1386_s8 }
  0x36   : > { %s1388_s9 = scalar_lea.vmem %s1387_s8, 2048  ;;  %p1389_p2 = scmp.lt.s32.totalorder %s1563_s4, %s1387_s8 }
  0x37   : > { %p1384_p9 = pnand %p1382_p0, %p1342_p11  ;;  %p1390_p3 = scmp.lt.s32.totalorder %s1388_s9, %s1381_s19 }
  0x39   : > { %p1385_p13 = pneg %p1384_p9  ;;  %p1391_p7 = por %p1390_p3, %p1389_p2 }
  0x3b   : > { %p1392_p5 = pnand %p1391_p7, %p1385_p13 }
  0x3d   : > { %1395 = shalt.err (!%p1392_p5)
}
  0x3e   : > { %1286 = dma.hbm_to_vmem [thread:$0]  (!%p1512_p8), %s1553_s29, 1024, %s1563_s4, %s137_s24, %s1437_s16, %s1437_s16, %s1438_s22  }
  0x3f   : > { %160 = sbr.rel (%p1557_p1) target bundleno = 377 (0x179), region = 28 }
  0x44   : > { %s162_s15 = sand.u32 1, %s1426_s10   ;;  %p2461_p7 = scmp.ne.s32.totalorder %s2457_s18, 0 }
  0x45   : > { %s1264_s23 = sshll.u32 %s162_s15, 6  ;;  %s163_s25 = scalar_lea.sflag [#allocation3], %s162_s15 }
  0x46   : > { %s1594_s3 = scalar_lea.vmem [#allocation2], %s1264_s23 }
  0x47   : > { %1413 = dma.done.wait (%p2461_p7), %s163_s25, 1024  }
  0x48   : > { %1415 = vsyncadd (%p2461_p7), %s163_s25, 4294966272  ;;  %s172_s27 = scalar_lea.sflag [#allocation5], %s162_s15  ;;  %s1600_s26 = scalar_lea.vmem [#allocation4], %s1264_s23 }
  0x49   : > { %1417 = dma.done.wait (%p2461_p7), %s172_s27, 1024  }
  0x4a   : > { %1419 = vsyncadd (%p2461_p7), %s172_s27, 4294966272  ;;  %v1607_v0 = vld [vmem:[%s1594_s3 + $0x18] sm:$0xff]  ;;  %v1610_v1 = vld [vmem:[%s1594_s3 + $0x8] sm:$0xff]  ;;  %vm235_vm0 = vcmask 1046528   ;;  %vm264_vm1 = vcmask 1045504   ;;  %s1440_s18 = smov 127  }
  0x4b   : > { %v1613_v2 = vld [vmem:[%s1594_s3 + $0x28] sm:$0xff]  ;;  %v240_v3 = vrot.slane %v1607_v0, 1  ;;  %v269_v4 = vrot.slane %v1607_v0, 2  ;;  %v237_v5 = vrot.slane %v1610_v1, 1  ;;  %v266_v6 = vrot.slane %v1610_v1, 2  ;;  %v1620_v7 = vld [vmem:[%s1594_s3] sm:$0xff] }
  0x4c   : > { %v1623_v8 = vld [vmem:[%s1594_s3 + $0x38] sm:$0xff]  ;;  %v243_v9 = vrot.slane %v1613_v2, 1  ;;  %v236_v10 = vrot.slane %v1620_v7, 1  ;;  %v265_v11 = vrot.slane %v1620_v7, 2  ;;  %v1629_v12 = vld [vmem:[%s1594_s3 + $0x20] sm:$0xff]  ;;  %v272_v15 = vrot.slane %v1613_v2, 2 }
  0x4d   : > { %v259_v13 = vadd.f32 %v240_v3, %v1607_v0  ;;  %v257_v14 = vadd.f32 %v237_v5, %v1610_v1  ;;  %v246_v16 = vrot.slane %v1623_v8, 1  ;;  %v1636_v17 = vld [vmem:[%s1594_s3 + $0x10] sm:$0xff]  ;;  %v242_v21 = vrot.slane %v1629_v12, 1  ;;  %v1681_v44 = vld [vmem:[%s1600_s26 + $0x8] sm:$0xff]  ;;  %v1684_v45 = vld [vmem:[%s1600_s26] sm:$0xff]  ;;  %s1441_s16 = smov 126  }
  0x4e   : > { %v261_v18 = vadd.f32 %v243_v9, %v1613_v2  ;;  %v238_v19 = vsel %vm235_vm0, %v236_v10, %v237_v5  ;;  %v267_v20 = vsel %vm264_vm1, %v265_v11, %v266_v6  ;;  %v275_v25 = vrot.slane %v1623_v8, 2  ;;  %v1649_v26 = vld [vmem:[%s1594_s3 + $0x30] sm:$0xff]  ;;  %v1689_v48 = vld [vmem:[%s1600_s26 + $0x18] sm:$0xff]  ;;  %v1710_v59 = vld [vmem:[%s1600_s26 + $0x28] sm:$0xff]  ;;  %s2353_s22 = sshll.u32 %s1251_s13, 2 }
  0x4f   : > { %v1642_v22 = vadd.f32 %v269_v4, %v259_v13  ;;  %v1644_v23 = vadd.f32 %v266_v6, %v257_v14  ;;  %v256_v24 = vadd.f32 %v238_v19, %v1620_v7  ;;  %v263_v27 = vadd.f32 %v246_v16, %v1623_v8  ;;  %v1692_v49 = vld [vmem:[%s1600_s26 + $0x10] sm:$0xff]  ;;  %v1717_v60 = vld [vmem:[%s1600_s26 + $0x20] sm:$0xff]  ;;  %p205_p8 = scmp.lt.s32.totalorder %s2353_s22, 7 }
  0x50   : > { %v244_v28 = vsel %vm235_vm0, %v242_v21, %v243_v9  ;;  %v271_v29 = vrot.slane %v1629_v12, 2  ;;  %v239_v30 = vrot.slane %v1636_v17, 1  ;;  %v1659_v31 = vadd.f32 %v272_v15, %v261_v18 }
  0x51   : > { %307 = vrot.lane.b32.xlu1 %v1642_v22, %s1440_s18  ;;  %303 = vrot.lane.b32.xlu0 %v1644_v23, %s1440_s18  ;;  %v1661_v32 = vadd.f32 %v267_v20, %v256_v24  ;;  %v260_v33 = vadd.f32 %v244_v28, %v1629_v12  ;;  %v268_v34 = vrot.slane %v1636_v17, 2  ;;  %v245_v37 = vrot.slane %v1649_v26, 1  ;;  %v1743_v20 = vld [vmem:[%s1600_s26 + $0x38] sm:$0xff]  ;;  %s2514_s22 = smov (!%p205_p8, %s2353_s22), 7 }
  0x52   : > { %v273_v35 = vsel %vm264_vm1, %v271_v29, %v272_v15  ;;  %v241_v36 = vsel %vm235_vm0, %v239_v30, %v240_v3  ;;  %v274_v38 = vrot.slane %v1649_v26, 2  ;;  %v1669_v39 = vadd.f32 %v275_v25, %v263_v27  ;;  %s1275_s12 = sshll.u32 %s2514_s22, 4 }
  0x53   : > { %v247_v40 = vsel %vm235_vm0, %v245_v37, %v246_v16  ;;  %v1676_v41 = vadd.f32 %v273_v35, %v260_v33  ;;  %v258_v42 = vadd.f32 %v241_v36, %v1636_v17  ;;  %v270_v46 = vsel %vm264_vm1, %v268_v34, %v269_v4  ;;  %s2391_s30 = scalar_lea.vmem %s2429_s2, %s1275_s12 }
  0x54   : > { %v262_v43 = vadd.f32 %v247_v40, %v1649_v26  ;;  %v276_v47 = vsel %vm264_vm1, %v274_v38, %v275_v25  ;;  %v382_v50 = vrot.slane %v1681_v44, 1  ;;  %v381_v51 = vrot.slane %v1684_v45, 1 }
  0x55   : > { %311 = vrot.lane.b32.xlu1 %v1659_v31, %s1440_s18  ;;  %301 = vrot.lane.b32.xlu0 %v1661_v32, %s1440_s18  ;;  %v1700_v52 = vadd.f32 %v270_v46, %v258_v42  ;;  %v385_v54 = vrot.slane %v1689_v48, 1  ;;  %v384_v55 = vrot.slane %v1692_v49, 1  ;;  %v410_v56 = vrot.slane %v1681_v44, 2 }
  0x56   : > { %v1702_v53 = vadd.f32 %v276_v47, %v262_v43  ;;  %v383_v57 = vsel %vm235_vm0, %v381_v51, %v382_v50  ;;  %v409_v58 = vrot.slane %v1684_v45, 2  ;;  %v402_v61 = vadd.f32 %v382_v50, %v1681_v44  ;;  %v1774_v43 = vld [vmem:[%s1600_s26 + $0x30] sm:$0xff] }
  0x57   : > { %v413_v62 = vrot.slane %v1689_v48, 2  ;;  %v386_v63 = vsel %vm235_vm0, %v384_v55, %v385_v54  ;;  %v412_v3 = vrot.slane %v1692_v49, 2  ;;  %v401_v4 = vadd.f32 %v383_v57, %v1684_v45 }
  0x58   : > { %v388_v5 = vrot.slane %v1710_v59, 1  ;;  %v411_v6 = vsel %vm264_vm1, %v409_v58, %v410_v56  ;;  %v404_v9 = vadd.f32 %v385_v54, %v1689_v48  ;;  %v387_v10 = vrot.slane %v1717_v60, 1 }
  0x59   : > { %315 = vrot.lane.b32.xlu1 %v1669_v39, %s1440_s18  ;;  %309 = vrot.lane.b32.xlu0 %v1676_v41, %s1440_s18  ;;  %v403_v11 = vadd.f32 %v386_v63, %v1692_v49  ;;  %v1733_v13 = vadd.f32 %v410_v56, %v402_v61  ;;  %v414_v14 = vsel %vm264_vm1, %v412_v3, %v413_v62  ;;  %v416_v19 = vrot.slane %v1710_v59, 2 }
  0x5a   : > { %v543_v15 = vmul.f32 %v1636_v17, %v1636_v17  ;;  %v1738_v16 = vadd.f32 %v411_v6, %v401_v4  ;;  %v406_v18 = vadd.f32 %v388_v5, %v1710_v59  ;;  %v1747_v21 = vmul.f32 %v1607_v0, %v1607_v0 }
  0x5b   : > { %v1749_v24 = vadd.f32 %v413_v62, %v404_v9  ;;  %v389_v25 = vsel %vm235_vm0, %v387_v10, %v388_v5  ;;  %v1756_v29 = vadd.f32 %v414_v14, %v403_v11  ;;  %v415_v30 = vrot.slane %v1717_v60, 2 }
  0x5c   : > { %v560_v27 = vrot.slane %v543_v15, 1  ;;  %v588_v28 = vrot.slane %v543_v15, 2  ;;  %v2438_v33 = vrot.slane %v1747_v21, 1  ;;  %v2437_v34 = vrot.slane %v1747_v21, 2 }
  0x5d   : > { %305 = vrot.lane.b32.xlu1 %v1700_v52, %s1440_s18  ;;  %313 = vrot.lane.b32.xlu0 %v1702_v53, %s1440_s18  ;;  %v391_v35 = vrot.slane %v1743_v20, 1  ;;  %v703_v36 = vmul.f32 %v1692_v49, %v1692_v49  ;;  %v1766_v37 = vmul.f32 %v1689_v48, %v1689_v48  ;;  %v545_v38 = vmul.f32 %v1629_v12, %v1629_v12 }
  0x5e   : > { %v1770_v40 = vadd.f32 %v416_v19, %v406_v18  ;;  %v405_v42 = vadd.f32 %v389_v25, %v1717_v60  ;;  %v562_v46 = vsel %vm235_vm0, %v560_v27, %v2438_v33  ;;  %v590_v47 = vsel %vm264_vm1, %v588_v28, %v2437_v34 }
  0x5f   : > { %v579_v50 = vadd.f32 %v562_v46, %v543_v15  ;;  %v720_v51 = vrot.slane %v703_v36, 1  ;;  %v2436_v54 = vrot.slane %v1766_v37, 1  ;;  %v748_v55 = vrot.slane %v703_v36, 2 }
  0x60   : > { %v417_v56 = vsel %vm264_vm1, %v415_v30, %v416_v19  ;;  %v2435_v57 = vrot.slane %v1766_v37, 2  ;;  %v1791_v58 = vmul.f32 %v1613_v2, %v1613_v2  ;;  %v563_v61 = vrot.slane %v545_v38, 1 }
  0x61   : > { %335 = vrot.lane.b32.xlu1 %v1644_v23, %s1441_s16  ;;  %333 = vrot.lane.b32.xlu0 %v1661_v32, %s1441_s16  ;;  %v390_v62 = vrot.slane %v1774_v43, 1  ;;  %v1794_v63 = vadd.f32 %v590_v47, %v579_v50  ;;  %v722_v3 = vsel %vm235_vm0, %v720_v51, %v2436_v54  ;;  %v591_v4 = vrot.slane %v545_v38, 2 }
  0x62   : > { %v739_v5 = vadd.f32 %v722_v3, %v703_v36  ;;  %v750_v6 = vsel %vm264_vm1, %v748_v55, %v2435_v57  ;;  %v2434_v9 = vrot.slane %v1791_v58, 1  ;;  %v2433_v10 = vrot.slane %v1791_v58, 2 }
  0x63   : > { %v408_v11 = vadd.f32 %v391_v35, %v1743_v20  ;;  %v705_v14 = vmul.f32 %v1717_v60, %v1717_v60  ;;  %v1809_v15 = vmul.f32 %v1710_v59, %v1710_v59  ;;  %v1813_v18 = vmul.f32 %v1623_v8, %v1623_v8 }
  0x64   : > { %v419_v19 = vrot.slane %v1743_v20, 2  ;;  %v1820_v25 = vadd.f32 %v750_v6, %v739_v5  ;;  %v565_v27 = vsel %vm235_vm0, %v563_v61, %v2434_v9  ;;  %v593_v28 = vsel %vm264_vm1, %v591_v4, %v2433_v10 }
  0x65   : > { %339 = vrot.lane.b32.xlu1 %v1642_v22, %s1441_s16  ;;  %337 = vrot.lane.b32.xlu0 %v1700_v52, %s1441_s16  ;;  %v418_v30 = vrot.slane %v1774_v43, 2  ;;  %v581_v36 = vadd.f32 %v565_v27, %v545_v38  ;;  %v723_v46 = vrot.slane %v705_v14, 1  ;;  %v2432_v47 = vrot.slane %v1809_v15, 1 }
  0x66   : > { %v1832_v50 = vmul.f32 %v1620_v7, %v1620_v7  ;;  %v1836_v51 = vmul.f32 %v1610_v1, %v1610_v1  ;;  %v751_v55 = vrot.slane %v705_v14, 2  ;;  %v2431_v61 = vrot.slane %v1809_v15, 2 }
  0x67   : > { %v1839_v3 = vadd.f32 %v417_v56, %v405_v42  ;;  %v392_v4 = vsel %vm235_vm0, %v390_v62, %v391_v35  ;;  %v1842_v5 = vadd.f32 %v593_v28, %v581_v36  ;;  %v725_v38 = vsel %vm235_vm0, %v723_v46, %v2432_v47 }
  0x68   : > { %v1853_v6 = vmul.f32 %v1684_v45, %v1684_v45  ;;  %v741_v42 = vadd.f32 %v725_v38, %v705_v14  ;;  %v753_v35 = vsel %vm264_vm1, %v751_v55, %v2431_v61  ;;  %v2439_v56 = vrot.slane %v1813_v18, 1 }
  0x69   : > { %343 = vrot.lane.b32.xlu1 %v1659_v31, %s1441_s16  ;;  %341 = vrot.lane.b32.xlu0 %v1676_v41, %s1441_s16  ;;  %v2440_v62 = vrot.slane %v1813_v18, 2  ;;  %v547_v27 = vmul.f32 %v1649_v26, %v1649_v26  ;;  %v1864_v28 = vmul.f32 %v1743_v20, %v1743_v20  ;;  %v707_v36 = vmul.f32 %v1774_v43, %v1774_v43 }
  0x6a   : > { %v407_v14 = vadd.f32 %v392_v4, %v1774_v43  ;;  %v1869_v46 = vadd.f32 %v753_v35, %v741_v42  ;;  %v1873_v55 = vmul.f32 %v1681_v44, %v1610_v1  ;;  %v861_v38 = vmul.f32 %v1684_v45, %v1620_v7 }
  0x6b   : > { %v566_v61 = vrot.slane %v547_v27, 1  ;;  %v594_v47 = vrot.slane %v547_v27, 2  ;;  %v727_v10 = vrot.slane %v1864_v28, 1  ;;  %v755_v9 = vrot.slane %v1864_v28, 2 }
  0x6c   : > { %v420_v4 = vsel %vm264_vm1, %v418_v30, %v419_v19  ;;  %v726_v42 = vrot.slane %v707_v36, 1  ;;  %v754_v1 = vrot.slane %v707_v36, 2  ;;  %v877_v54 = vrot.slane %v861_v38, 1 }
  0x6d   : > { %347 = vrot.lane.b32.xlu1 %v1669_v39, %s1441_s16  ;;  %345 = vrot.lane.b32.xlu0 %v1702_v53, %s1441_s16  ;;  %v568_v7 = vsel %vm235_vm0, %v566_v61, %v2439_v56  ;;  %v596_v45 = vsel %vm264_vm1, %v594_v47, %v2440_v62  ;;  %v1894_v34 = vmul.f32 %v1681_v44, %v1681_v44  ;;  %v2462_v47 = vrot.slane %v1873_v55, 1 }
  0x6e   : > { %v583_v30 = vadd.f32 %v568_v7, %v547_v27  ;;  %v728_v33 = vsel %vm235_vm0, %v726_v42, %v727_v10  ;;  %v756_v61 = vsel %vm264_vm1, %v754_v1, %v755_v9  ;;  %v1902_v56 = vadd.f32 %v419_v19, %v408_v11 }
  0x6f   : > { %v743_v35 = vadd.f32 %v728_v33, %v707_v36  ;;  %v879_v62 = vsel %vm235_vm0, %v877_v54, %v2462_v47  ;;  %v905_v57 = vrot.slane %v861_v38, 2  ;;  %v1911_v44 = vadd.f32 %v420_v4, %v407_v14 }
  0x70   : > { %v1913_v27 = vadd.f32 %v596_v45, %v583_v30  ;;  %v897_v42 = vadd.f32 %v879_v62, %v861_v38  ;;  %v2463_v33 = vrot.slane %v1873_v55, 2  ;;  %v1922_v54 = vmul.f32 %v1689_v48, %v1607_v0 }
  0x71   : > { %447 = vrot.lane.b32.xlu1 %v1733_v13, %s1440_s18  ;;  %445 = vrot.lane.b32.xlu0 %v1738_v16, %s1440_s18  ;;  %v1915_v1 = vadd.f32 %v756_v61, %v743_v35  ;;  %v863_v19 = vmul.f32 %v1692_v49, %v1636_v17  ;;  %v1930_v14 = vmul.f32 %v1710_v59, %v1613_v2  ;;  %v558_v59 = vrot.slane %v1836_v51, 1 }
  0x72   : > { %v907_v11 = vsel %vm264_vm1, %v905_v57, %v2463_v33  ;;  %v865_v62 = vmul.f32 %v1717_v60, %v1629_v12  ;;  %v1936_v38 = vmul.f32 %v1743_v20, %v1623_v8  ;;  %v881_v57 = vrot.slane %v1922_v54, 1 }
  0x73   : > { %v1926_v36 = vadd.f32 %v907_v11, %v897_v42  ;;  %v909_v0 = vrot.slane %v1922_v54, 2  ;;  %v880_v48 = vrot.slane %v863_v19, 1  ;;  %v908_v4 = vrot.slane %v863_v19, 2 }
  0x74   : > { %v884_v2 = vrot.slane %v1930_v14, 1  ;;  %v2441_v12 = vrot.slane %v1930_v14, 2  ;;  %v883_v17 = vrot.slane %v865_v62, 1  ;;  %v911_v49 = vrot.slane %v865_v62, 2 }
  0x75   : > { %451 = vrot.lane.b32.xlu1 %v1749_v24, %s1440_s18  ;;  %449 = vrot.lane.b32.xlu0 %v1756_v29, %s1440_s18  ;;  %2464 = vst [vmem:[#allocation8_spill] sm:$0xff] %v1926_v36  ;;  %v557_v8 = vrot.slane %v1832_v50, 1  ;;  %v882_v60 = vsel %vm235_vm0, %v880_v48, %v881_v57  ;;  %v910_v20 = vsel %vm264_vm1, %v908_v4, %v909_v0  ;;  %v585_v30 = vrot.slane %v1832_v50, 2 }
  0x76   : > { %v899_v35 = vadd.f32 %v882_v60, %v863_v19  ;;  %v885_v7 = vsel %vm235_vm0, %v883_v17, %v884_v2  ;;  %v913_v45 = vsel %vm264_vm1, %v911_v49, %v2441_v12  ;;  %v586_v61 = vrot.slane %v1836_v51, 2 }
  0x77   : > { %v901_v47 = vadd.f32 %v885_v7, %v865_v62  ;;  %v887_v33 = vrot.slane %v1936_v38, 1  ;;  %v915_v11 = vrot.slane %v1936_v38, 2  ;;  %v867_v19 = vmul.f32 %v1774_v43, %v1649_v26 }
  0x78   : > { %v1966_v42 = vadd.f32 %v910_v20, %v899_v35  ;;  %v559_v48 = vsel %vm235_vm0, %v557_v8, %v558_v59  ;;  %v717_v4 = vrot.slane %v1853_v6, 1  ;;  %v718_v62 = vrot.slane %v1894_v34, 1 }
  0x79   : > { %455 = vrot.lane.b32.xlu1 %v1770_v40, %s1440_s18  ;;  %453 = vrot.lane.b32.xlu0 %v1839_v3, %s1440_s18  ;;  %v1975_v17 = vadd.f32 %v913_v45, %v901_v47  ;;  %v886_v49 = vrot.slane %v867_v19, 1  ;;  %v914_v60 = vrot.slane %v867_v19, 2  ;;  %v577_v20 = vadd.f32 %v559_v48, %v1832_v50 }
  0x7a   : > { %2465 = vst [vmem:[#allocation9_spill] sm:$0xff] %v1966_v42  ;;  %v745_v26 = vrot.slane %v1853_v6, 2  ;;  %v587_v35 = vsel %vm264_vm1, %v585_v30, %v586_v61  ;;  %v719_v7 = vsel %vm235_vm0, %v717_v4, %v718_v62  ;;  %v746_v45 = vrot.slane %v1894_v34, 2 }
  0x7b   : > { %2466 = vst [vmem:[#allocation10_spill] sm:$0xff] %v1975_v17  ;;  %v888_v43 = vsel %vm235_vm0, %v886_v49, %v887_v33  ;;  %v916_v8 = vsel %vm264_vm1, %v914_v60, %v915_v11  ;;  %v1998_v50 = vadd.f32 %v587_v35, %v577_v20  ;;  %v737_v48 = vadd.f32 %v719_v7, %v1853_v6 }
  0x7c   : > { %v903_v47 = vadd.f32 %v888_v43, %v867_v19  ;;  %v578_v49 = vadd.f32 %v558_v59, %v1836_v51  ;;  %v747_v30 = vsel %vm264_vm1, %v745_v26, %v746_v45  ;;  %v738_v60 = vadd.f32 %v718_v62, %v1894_v34 }
  0x7d   : > { %459 = vrot.lane.b32.xlu1 %v1902_v56, %s1440_s18  ;;  %457 = vrot.lane.b32.xlu0 %v1911_v44, %s1440_s18  ;;  %v2007_v19 = vadd.f32 %v747_v30, %v737_v48  ;;  %v2468_v6 = vrot.slane %v1747_v21, 1  ;;  %v2469_v34 = vrot.slane %v1747_v21, 2  ;;  %v2470_v62 = vrot.slane %v1766_v37, 1 }
  0x7e   : > { %v1992_v12 = vadd.f32 %v916_v8, %v903_v47  ;;  %v2009_v4 = vadd.f32 %v586_v61, %v578_v49  ;;  %v2016_v51 = vadd.f32 %v746_v45, %v738_v60  ;;  %v2471_v26 = vrot.slane %v1766_v37, 2 }
  0x7f   : > { %v580_v59 = vadd.f32 %v2468_v6, %v1747_v21  ;;  %v740_v20 = vadd.f32 %v2470_v62, %v1766_v37  ;;  %v2472_v8 = vrot.slane %v1791_v58, 1  ;;  %v2473_v35 = vrot.slane %v1791_v58, 2 }
  0x80   : > { %2467 = vst [vmem:[#allocation11_spill] sm:$0xff] %v1992_v12  ;;  %v2474_v37 = vrot.slane %v1809_v15, 1  ;;  %v2476_v48 = vrot.slane %v1813_v18, 1  ;;  %v744_v60 = vadd.f32 %v727_v10, %v1864_v28  ;;  %vm1151_vm2 = vcmask 111616  }
  0x81   : > { %479 = vrot.lane.b32.xlu1 %v1733_v13, %s1441_s16  ;;  %477 = vrot.lane.b32.xlu0 %v1738_v16, %s1441_s16  ;;  %v2027_v61 = vadd.f32 %v2469_v34, %v580_v59  ;;  %v2038_v43 = vadd.f32 %v2471_v26, %v740_v20  ;;  %v582_v21 = vadd.f32 %v2472_v8, %v1791_v58  ;;  %v2475_v58 = vrot.slane %v1809_v15, 2 }
  0x82   : > { %v742_v45 = vadd.f32 %v2474_v37, %v1809_v15  ;;  %v584_v49 = vadd.f32 %v2476_v48, %v1813_v18  ;;  %v2477_v15 = vrot.slane %v1813_v18, 2  ;;  %v2094_v18 = vadd.f32 %v755_v9, %v744_v60 }
  0x83   : > { %v2049_v7 = vadd.f32 %v2473_v35, %v582_v21  ;;  %v2478_v59 = vrot.slane %v1873_v55, 1  ;;  %v2479_v26 = vrot.slane %v1873_v55, 2  ;;  %v900_v21 = vadd.f32 %v881_v57, %v1922_v54 }
  0x84   : > { %v2064_v47 = vadd.f32 %v2475_v58, %v742_v45  ;;  %v2079_v30 = vadd.f32 %v2477_v15, %v584_v49  ;;  %v2482_v54 = vrot.slane %v1930_v14, 2  ;;  %vm1149_vm3 = vcmask 113664  }
  0x85   : > { %483 = vrot.lane.b32.xlu1 %v1749_v24, %s1441_s16  ;;  %481 = vrot.lane.b32.xlu0 %v1756_v29, %s1441_s16  ;;  %v898_v34 = vadd.f32 %v2478_v59, %v1873_v55  ;;  %v2136_v45 = vadd.f32 %v909_v0, %v900_v21  ;;  %v902_v55 = vadd.f32 %v884_v2, %v1930_v14 }
  0x86   : > { %v904_v14 = vadd.f32 %v887_v33, %v1936_v38 }
  0x87   : > { %v2125_v8 = vadd.f32 %v2479_v26, %v898_v34  ;;  %2481 = vst [vmem:[#allocation13_spill] sm:$0xff] %v2136_v45  ;;  %v2149_v0 = vadd.f32 %v2482_v54, %v902_v55 }
  0x89   : > { %487 = vrot.lane.b32.xlu1 %v1770_v40, %s1441_s16  ;;  %485 = vrot.lane.b32.xlu0 %v1839_v3, %s1441_s16  ;;  %2480 = vst [vmem:[#allocation12_spill] sm:$0xff] %v2125_v8  ;;  %2483 = vst [vmem:[#allocation14_spill] sm:$0xff] %v2149_v0 }
  0x8d   : > { %621 = vrot.lane.b32.xlu1 %v1998_v50, %s1440_s18  ;;  %489 = vrot.lane.b32.xlu0 %v1911_v44, %s1441_s16 }
  0x91   : > { %781 = vrot.lane.b32.xlu1 %v2007_v19, %s1440_s18  ;;  %623 = vrot.lane.b32.xlu0 %v2009_v4, %s1440_s18 }
  0x95   : > { %625 = vrot.lane.b32.xlu1 %v1794_v63, %s1440_s18  ;;  %783 = vrot.lane.b32.xlu0 %v2016_v51, %s1440_s18 }
  0x99   : > { %785 = vrot.lane.b32.xlu1 %v1820_v25, %s1440_s18  ;;  %627 = vrot.lane.b32.xlu0 %v2027_v61, %s1440_s18 }
  0x9d   : > { %629 = vrot.lane.b32.xlu1 %v1842_v5, %s1440_s18  ;;  %787 = vrot.lane.b32.xlu0 %v2038_v43, %s1440_s18 }
  0xa1   : > { %653 = vrot.lane.b32.xlu1 %v1998_v50, %s1441_s16  ;;  %631 = vrot.lane.b32.xlu0 %v2049_v7, %s1440_s18 }
  0xa5   : > { %789 = vrot.lane.b32.xlu1 %v1869_v46, %s1440_s18  ;;  %655 = vrot.lane.b32.xlu0 %v2009_v4, %s1441_s16 }
  0xa9   : > { %813 = vrot.lane.b32.xlu1 %v2007_v19, %s1441_s16  ;;  %791 = vrot.lane.b32.xlu0 %v2064_v47, %s1440_s18 }
  0xad   : > { %491 = vrot.lane.b32.xlu1 %v1902_v56, %s1441_s16  ;;  %815 = vrot.lane.b32.xlu0 %v2016_v51, %s1441_s16 }
  0xb1   : > { %635 = vrot.lane.b32.xlu1 %v2079_v30, %s1440_s18  ;;  %633 = vrot.lane.b32.xlu0 %v1913_v27, %s1440_s18 }
  0xb5   : > { %659 = vrot.lane.b32.xlu1 %v2027_v61, %s1441_s16  ;;  %657 = vrot.lane.b32.xlu0 %v1794_v63, %s1441_s16 }
  0xb9   : > { %795 = vrot.lane.b32.xlu1 %v2094_v18, %s1440_s18  ;;  %793 = vrot.lane.b32.xlu0 %v1915_v1, %s1440_s18 }
  0xbd   : > { %819 = vrot.lane.b32.xlu1 %v2038_v43, %s1441_s16  ;;  %817 = vrot.lane.b32.xlu0 %v1820_v25, %s1441_s16 }
  0xc1   : > { %663 = vrot.lane.b32.xlu1 %v2049_v7, %s1441_s16  ;;  %661 = vrot.lane.b32.xlu0 %v1842_v5, %s1441_s16 }
  0xc3   : > { %v308_v9 = vpop.permute.xlu1 %307  ;;  %v304_v10 = vpop.permute.xlu0 %303 }
  0xc4   : > { %v326_v58 = vadd.f32 %v304_v10, %v1644_v23  ;;  %v328_v2 = vadd.f32 %v308_v9, %v1642_v22 }
  0xc5   : > { %823 = vrot.lane.b32.xlu1 %v2064_v47, %s1441_s16  ;;  %821 = vrot.lane.b32.xlu0 %v1869_v46, %s1441_s16 }
  0xc7   : > { %v312_v28 = vpop.permute.xlu1 %311  ;;  %v302_v6 = vpop.permute.xlu0 %301 }
  0xc8   : > { %v325_v57 = vadd.f32 %v302_v6, %v1661_v32  ;;  %v330_v34 = vadd.f32 %v312_v28, %v1659_v31 }
  0xc9   : > { %667 = vrot.lane.b32.xlu1 %v2079_v30, %s1441_s16  ;;  %665 = vrot.lane.b32.xlu0 %v1913_v27, %s1441_s16 }
  0xcb   : > { %v316_v62 = vpop.permute.xlu1 %315  ;;  %v310_v20 = vpop.permute.xlu0 %309 }
  0xcc   : > { %v329_v22 = vadd.f32 %v310_v20, %v1676_v41  ;;  %v332_v33 = vadd.f32 %v316_v62, %v1669_v39 }
  0xcd   : > { %827 = vrot.lane.b32.xlu1 %v2094_v18, %s1441_s16  ;;  %825 = vrot.lane.b32.xlu0 %v1915_v1, %s1441_s16 }
  0xcf   : > { %v306_v35 = vpop.permute.xlu1 %305  ;;  %v314_v37 = vpop.permute.xlu0 %313 }
  0xd0   : > { %v327_v23 = vadd.f32 %v306_v35, %v1700_v52  ;;  %v2170_v35 = vadd.f32 %v915_v11, %v904_v14  ;;  %v331_v31 = vadd.f32 %v314_v37, %v1702_v53 }
  0xd1   : > { %943 = vrot.lane.b32.xlu1 %v2125_v8, %s1440_s18  ;;  %941 = vrot.lane.b32.xlu0 %v1926_v36, %s1440_s18 }
  0xd2   : > { %2484 = vst [vmem:[#allocation15_spill] sm:$0xff] %v2170_v35 }
  0xd3   : > { %v336_v48 = vpop.permute.xlu1 %335  ;;  %v334_v49 = vpop.permute.xlu0 %333 }
  0xd4   : > { %v358_v15 = vadd.f32 %v336_v48, %v326_v58  ;;  %v357_v60 = vadd.f32 %v334_v49, %v325_v57 }
  0xd5   : > { %947 = vrot.lane.b32.xlu1 %v2136_v45, %s1440_s18  ;;  %945 = vrot.lane.b32.xlu0 %v1966_v42, %s1440_s18 }
  0xd6   : > { %v366_v54 = vmul.f32 0.11111111, %v358_v15 }
  0xd7   : > { %v340_v10 = vpop.permute.xlu1 %339  ;;  %v338_v32 = vpop.permute.xlu0 %337 }
  0xd8   : > { %v360_v6 = vadd.f32 %v340_v10, %v328_v2  ;;  %v359_v59 = vadd.f32 %v338_v32, %v327_v23  ;;  %v365_v2 = vmul.f32 0.11111111, %v357_v60 }
  0xd9   : > { %951 = vrot.lane.b32.xlu1 %v2149_v0, %s1440_s18  ;;  %949 = vrot.lane.b32.xlu0 %v1975_v17, %s1440_s18 }
  0xdb   : > { %v344_v9 = vpop.permute.xlu1 %343  ;;  %v342_v52 = vpop.permute.xlu0 %341 }
  0xdc   : > { %v362_v26 = vadd.f32 %v344_v9, %v330_v34  ;;  %v2162_v21 = vadd.f32 %v342_v52, %v329_v22  ;;  %v2198_v9 = vmul.f32 %v366_v54, %v366_v54  ;;  %v2200_v52 = vmul.f32 %v365_v2, %v365_v2 }
  0xdd   : > { %975 = vrot.lane.b32.xlu1 %v2125_v8, %s1441_s16  ;;  %973 = vrot.lane.b32.xlu0 %v1926_v36, %s1441_s16 }
  0xdf   : > { %v348_v41 = vpop.permute.xlu1 %347  ;;  %v346_v28 = vpop.permute.xlu0 %345 }
  0xe0   : > { %v2174_v20 = vadd.f32 %v348_v41, %v332_v33  ;;  %v2176_v55 = vadd.f32 %v346_v28, %v331_v31 }
  0xe1   : > { %955 = vrot.lane.b32.xlu1 %v2170_v35, %s1440_s18  ;;  %953 = vrot.lane.b32.xlu0 %v1992_v12, %s1440_s18 }
  0xe3   : > { %v448_v58 = vpop.permute.xlu1 %447  ;;  %v446_v38 = vpop.permute.xlu0 %445 }
  0xe4   : > { %v470_v48 = vadd.f32 %v448_v58, %v1733_v13  ;;  %v469_v49 = vadd.f32 %v446_v38, %v1738_v16  ;;  %v368_v58 = vmul.f32 0.11111111, %v360_v6 }
  0xe5   : > { %979 = vrot.lane.b32.xlu1 %v2136_v45, %s1441_s16  ;;  %977 = vrot.lane.b32.xlu0 %v1966_v42, %s1441_s16 }
  0xe7   : > { %v452_v39 = vpop.permute.xlu1 %451  ;;  %v450_v53 = vpop.permute.xlu0 %449 }
  0xe8   : > { %v472_v33 = vadd.f32 %v452_v39, %v1749_v24  ;;  %v471_v31 = vadd.f32 %v450_v53, %v1756_v29  ;;  %v370_v39 = vmul.f32 0.11111111, %v362_v26 }
  0xe9   : > { %983 = vrot.lane.b32.xlu1 %v2149_v0, %s1441_s16  ;;  %981 = vrot.lane.b32.xlu0 %v1975_v17, %s1441_s16 }
  0xeb   : > { %v456_v11 = vpop.permute.xlu1 %455  ;;  %v454_v62 = vpop.permute.xlu0 %453 }
  0xec   : > { %v473_v6 = vadd.f32 %v454_v62, %v1839_v3 }
  0xed   : > { %987 = vrot.lane.b32.xlu1 %v2170_v35, %s1441_s16  ;;  %985 = vrot.lane.b32.xlu0 %v1992_v12, %s1441_s16 }
  0xef   : > { %v2194_v37 = vpop.permute.xlu1 %459  ;;  %v458_v57 = vpop.permute.xlu0 %457 }
  0xf3   : > { %v480_v23 = vpop.permute.xlu1 %479  ;;  %v478_v10 = vpop.permute.xlu0 %477 }
  0xf4   : > { %v502_v32 = vadd.f32 %v480_v23, %v470_v48  ;;  %v501_v14 = vadd.f32 %v478_v10, %v469_v49  ;;  %v367_v49 = vmul.f32 0.11111111, %v359_v59  ;;  %v474_v23 = vadd.f32 %v456_v11, %v1770_v40 }
  0xf6   : > { %v510_v34 = vmul.f32 0.11111111, %v502_v32  ;;  %v509_v22 = vmul.f32 0.11111111, %v501_v14  ;;  %v2222_v14 = vmul.f32 %v368_v58, %v368_v58 }
  0xf7   : > { %v484_v41 = vpop.permute.xlu1 %483  ;;  %v482_v13 = vpop.permute.xlu0 %481 }
  0xf8   : > { %v2204_v28 = vmul.f32 %v510_v34, %v366_v54  ;;  %v2206_v16 = vmul.f32 %v510_v34, %v510_v34  ;;  %v2208_v15 = vmul.f32 %v509_v22, %v365_v2  ;;  %v2210_v60 = vmul.f32 %v509_v22, %v509_v22 }
  0xf9   : > { %v504_v38 = vadd.f32 %v484_v41, %v472_v33  ;;  %v503_v48 = vadd.f32 %v482_v13, %v471_v31  ;;  %v2230_v34 = vmul.f32 %v367_v49, %v367_v49  ;;  %v2234_v31 = vmul.f32 %v370_v39, %v370_v39 }
  0xfa   : > { %2485 = vst [vmem:[#allocation16_spill] sm:$0xff] %v2204_v28  ;;  %2486 = vst [vmem:[#allocation17_spill] sm:$0xff] %v2208_v15  ;;  %v2215_v24 = vadd.f32 %v2206_v16, %v2198_v9  ;;  %v2219_v29 = vadd.f32 %v2210_v60, %v2200_v52  ;;  %v369_v41 = vmul.f32 0.11111111, %v2162_v21 }
  0xfb   : > { %v512_v53 = vmul.f32 0.11111111, %v504_v38  ;;  %v511_v54 = vmul.f32 0.11111111, %v503_v48  ;;  %v488_v2 = vpop.permute.xlu1 %487  ;;  %v486_v10 = vpop.permute.xlu0 %485 }
  0xfc   : > { %v506_v32 = vadd.f32 %v488_v2, %v474_v23  ;;  %v505_v33 = vadd.f32 %v486_v10, %v473_v6  ;;  %v475_v23 = vadd.f32 %v458_v57, %v1911_v44  ;;  %v371_v2 = vmul.f32 0.11111111, %v2176_v55 }
  0xfd   : > { %v2224_v59 = vmul.f32 %v512_v53, %v368_v58  ;;  %v2226_v40 = vmul.f32 %v512_v53, %v512_v53  ;;  %v2228_v11 = vmul.f32 %v511_v54, %v367_v49  ;;  %v2232_v22 = vmul.f32 %v511_v54, %v511_v54 }
  0xfe   : > { %v514_v26 = vmul.f32 0.11111111, %v506_v32  ;;  %v513_v49 = vmul.f32 0.11111111, %v505_v33  ;;  %v2256_v54 = vmul.f32 %v369_v41, %v369_v41  ;;  %v2265_v57 = vmul.f32 %v371_v2, %v371_v2 }
  0xff   : > { %2487 = vst [vmem:[#allocation18_spill] sm:$0xff] %v2224_v59  ;;  %2488 = vst [vmem:[#allocation19_spill] sm:$0xff] %v2228_v11  ;;  %v2239_v3 = vadd.f32 %v2226_v40, %v2222_v14  ;;  %v622_v62 = vpop.permute.xlu1 %621  ;;  %v490_v13 = vpop.permute.xlu0 %489  ;;  %v2243_v58 = vadd.f32 %v2232_v22, %v2230_v34 }
 0x100   : > { %v2245_v38 = vmul.f32 %v514_v26, %v370_v39  ;;  %v2247_v48 = vmul.f32 %v514_v26, %v514_v26  ;;  %v2254_v53 = vmul.f32 %v513_v49, %v369_v41  ;;  %v2259_v10 = vmul.f32 %v513_v49, %v513_v49 }
 0x101   : > { %v507_v6 = vadd.f32 %v490_v13, %v475_v23  ;;  %v645_v0 = vadd.f32 %v622_v62, %v1998_v50  ;;  %v476_v50 = vadd.f32 %v2194_v37, %v1902_v56 }
 0x102   : > { %2489 = vst [vmem:[#allocation20_spill] sm:$0xff] %v2245_v38  ;;  %v2252_v21 = vadd.f32 %v2247_v48, %v2234_v31  ;;  %2490 = vst [vmem:[#allocation21_spill] sm:$0xff] %v2254_v53  ;;  %v2263_v26 = vadd.f32 %v2259_v10, %v2256_v54 }
 0x103   : > { %v782_v39 = vpop.permute.xlu1 %781  ;;  %v624_v32 = vpop.permute.xlu0 %623  ;;  %v515_v44 = vmul.f32 0.11111111, %v507_v6 }
 0x104   : > { %v646_v38 = vadd.f32 %v624_v32, %v2009_v4  ;;  %v805_v11 = vadd.f32 %v782_v39, %v2007_v19 }
 0x105   : > { %v2267_v33 = vmul.f32 %v515_v44, %v371_v2  ;;  %v2269_v12 = vmul.f32 %v515_v44, %v515_v44 }
 0x107   : > { %2491 = vst [vmem:[#allocation22_spill] sm:$0xff] %v2267_v33  ;;  %v626_v41 = vpop.permute.xlu1 %625  ;;  %v784_v35 = vpop.permute.xlu0 %783  ;;  %v2273_v55 = vadd.f32 %v2269_v12, %v2265_v57 }
 0x108   : > { %v806_v62 = vadd.f32 %v784_v35, %v2016_v51 }
 0x109   : > { %2492 = vst [vmem:[#allocation23_spill] sm:$0xff] %v2273_v55 }
 0x10b   : > { %v786_v13 = vpop.permute.xlu1 %785  ;;  %v628_v49 = vpop.permute.xlu0 %627 }
 0x10f   : > { %v2275_v23 = vpop.permute.xlu1 %629  ;;  %v788_v17 = vpop.permute.xlu0 %787 }
 0x113   : > { %v654_v6 = vpop.permute.xlu1 %653  ;;  %v632_v42 = vpop.permute.xlu0 %631 }
 0x114   : > { %v677_v45 = vadd.f32 %v654_v6, %v645_v0 }
 0x116   : > { %v685_v2 = vmul.f32 0.11111111, %v677_v45  ;;  %v372_v45 = vmul.f32 0.11111111, %v2174_v20 }
 0x117   : > { %v2278_v33 = vpop.permute.xlu1 %789  ;;  %v656_v44 = vpop.permute.xlu0 %655 }
 0x118   : > { %v693_v53 = vsub.f32 %v685_v2, %v2200_v52  ;;  %v678_v59 = vadd.f32 %v656_v44, %v646_v38  ;;  %v2288_v2 = vmul.f32 %v372_v45, %v372_v45 }
 0x11a   : > { %v686_v6 = vmul.f32 0.11111111, %v678_v59 }
 0x11b   : > { %v814_v15 = vpop.permute.xlu1 %813  ;;  %v792_v28 = vpop.permute.xlu0 %791 }
 0x11c   : > { %v837_v36 = vadd.f32 %v814_v15, %v805_v11  ;;  %v1069_v15 = vadd.f32 0.0001, %v2219_v29  ;;  %v694_v56 = vsub.f32 %v686_v6, %v2198_v9  ;;  %v647_v29 = vadd.f32 %v626_v41, %v1794_v63 }
 0x11d   : > { %v808_v63 = vadd.f32 %v788_v17, %v2038_v43 }
 0x11e   : > { %v845_v0 = vmul.f32 0.11111111, %v837_v36 }
 0x11f   : > { %v492_v8 = vpop.permute.xlu1 %491  ;;  %v816_v55 = vpop.permute.xlu0 %815 }
 0x120   : > { %v853_v52 = vsub.f32 %v845_v0, %v2210_v60  ;;  %v508_v4 = vadd.f32 %v492_v8, %v476_v50  ;;  %v838_v32 = vadd.f32 %v816_v55, %v806_v62  ;;  %v1070_v55 = vadd.f32 0.0001, %v2215_v24 }
 0x121   : > { %v648_v62 = vadd.f32 %v628_v49, %v2027_v61  ;;  %v649_v61 = vadd.f32 %v2275_v23, %v1842_v5  ;;  %v650_v49 = vadd.f32 %v632_v42, %v2049_v7  ;;  %v810_v5 = vadd.f32 %v792_v28, %v2064_v47 }
 0x122   : > { %v1077_v19 = vadd.f32 %v853_v52, %v693_v53  ;;  %v516_v38 = vmul.f32 0.11111111, %v508_v4  ;;  %v846_v39 = vmul.f32 0.11111111, %v838_v32  ;;  %v807_v32 = vadd.f32 %v786_v13, %v1820_v25 }
 0x123   : > { %v636_v51 = vpop.permute.xlu1 %635  ;;  %v634_v36 = vpop.permute.xlu0 %633  ;;  %v1071_v23 = vadd.f32 0.0001, %v2243_v58 }
 0x124   : > { %v1085_v35 = vadd.f32 0.0009, %v1077_v19  ;;  %v2292_v20 = vmul.f32 %v516_v38, %v372_v45  ;;  %v2294_v37 = vmul.f32 %v516_v38, %v516_v38  ;;  %v854_v60 = vsub.f32 %v846_v39, %v2206_v16 }
 0x126   : > { %v2297_v8 = vmul.f32 %v1085_v35, %v1069_v15  ;;  %v2301_v59 = vadd.f32 %v2294_v37, %v2288_v2  ;;  %v1078_v11 = vadd.f32 %v854_v60, %v694_v56 }
 0x127   : > { %v660_v53 = vpop.permute.xlu1 %659  ;;  %v658_v9 = vpop.permute.xlu0 %657 }
 0x128   : > { %v1086_v44 = vadd.f32 0.0009, %v1078_v11  ;;  %v679_v50 = vadd.f32 %v658_v9, %v647_v29  ;;  %v680_v52 = vadd.f32 %v660_v53, %v648_v62  ;;  %v1072_v53 = vadd.f32 0.0001, %v2239_v3 }
 0x129   : > { %v809_v9 = vadd.f32 %v2278_v33, %v1869_v46  ;;  %v652_v62 = vadd.f32 %v636_v51, %v2079_v30  ;;  %1324 = vrcp.f32 %v2297_v8 }
 0x12a   : > { %v2306_v0 = vmul.f32 %v1086_v44, %v1070_v55  ;;  %v687_v16 = vmul.f32 0.11111111, %v679_v50  ;;  %v688_v38 = vmul.f32 0.11111111, %v680_v52 }
 0x12b   : > { %v796_v45 = vpop.permute.xlu1 %795  ;;  %v794_v6 = vpop.permute.xlu0 %793 }
 0x12c   : > { %v695_v4 = vsub.f32 %v687_v16, %v2230_v34  ;;  %v696_v34 = vsub.f32 %v688_v38, %v2222_v14  ;;  %v651_v16 = vadd.f32 %v634_v36, %v1913_v27  ;;  %v812_v27 = vadd.f32 %v796_v45, %v2094_v18 }
 0x12d   : > { %v811_v51 = vadd.f32 %v794_v6, %v1915_v1  ;;  %v1074_v36 = vadd.f32 0.0001, %v2252_v21  ;;  %1326 = vrcp.f32 %v2306_v0 }
 0x12f   : > { %v820_v41 = vpop.permute.xlu1 %819  ;;  %v818_v19 = vpop.permute.xlu0 %817 }
 0x130   : > { %v840_v24 = vadd.f32 %v820_v41, %v808_v63  ;;  %v839_v39 = vadd.f32 %v818_v19, %v807_v32 }
 0x132   : > { %v848_v15 = vmul.f32 0.11111111, %v840_v24  ;;  %v847_v56 = vmul.f32 0.11111111, %v839_v39 }
 0x133   : > { %v664_v35 = vpop.permute.xlu1 %663  ;;  %v662_v60 = vpop.permute.xlu0 %661 }
 0x134   : > { %v856_v25 = vsub.f32 %v848_v15, %v2226_v40  ;;  %v855_v17 = vsub.f32 %v847_v56, %v2232_v22  ;;  %v682_v43 = vadd.f32 %v664_v35, %v650_v49  ;;  %v681_v13 = vadd.f32 %v662_v60, %v649_v61 }
 0x136   : > { %v1080_v11 = vadd.f32 %v856_v25, %v696_v34  ;;  %v1079_v29 = vadd.f32 %v855_v17, %v695_v4  ;;  %v690_v40 = vmul.f32 0.11111111, %v682_v43  ;;  %v689_v44 = vmul.f32 0.11111111, %v681_v13  ;;  %v2493_v13 = vld [vmem:[#allocation23_spill] sm:$0xff] }
 0x137   : > { %v824_v42 = vpop.permute.xlu1 %823  ;;  %v822_v7 = vpop.permute.xlu0 %821 }
 0x138   : > { %v1088_v14 = vadd.f32 0.0009, %v1080_v11  ;;  %v1087_v55 = vadd.f32 0.0009, %v1079_v29  ;;  %v842_v22 = vadd.f32 %v824_v42, %v810_v5  ;;  %v841_v50 = vadd.f32 %v822_v7, %v809_v9 }
 0x139   : > { %v698_v32 = vsub.f32 %v690_v40, %v2234_v31  ;;  %v697_v63 = vsub.f32 %v689_v44, %v2256_v54  ;;  %v1073_v54 = vadd.f32 0.0001, %v2263_v26  ;;  %v1075_v26 = vadd.f32 0.0001, %v2493_v13 }
 0x13a   : > { %v2324_v3 = vmul.f32 %v1088_v14, %v1072_v53  ;;  %v2326_v52 = vmul.f32 %v1087_v55, %v1071_v23  ;;  %v850_v46 = vmul.f32 0.11111111, %v842_v22  ;;  %v849_v47 = vmul.f32 0.11111111, %v841_v50  ;;  %v2495_v23 = vld [vmem:[#allocation8_spill] sm:$0xff] }
 0x13b   : > { %v668_v28 = vpop.permute.xlu1 %667  ;;  %v666_v33 = vpop.permute.xlu0 %665  ;;  %v1076_v53 = vadd.f32 0.0001, %v2301_v59 }
 0x13c   : > { %v684_v4 = vadd.f32 %v668_v28, %v652_v62  ;;  %v683_v58 = vadd.f32 %v666_v33, %v651_v16  ;;  %v858_v41 = vsub.f32 %v850_v46, %v2247_v48  ;;  %v857_v30 = vsub.f32 %v849_v47, %v2259_v10  ;;  %v2496_v62 = vld [vmem:[#allocation16_spill] sm:$0xff]  ;;  %v2497_v46 = vld [vmem:[#allocation17_spill] sm:$0xff]  ;;  %v2498_v28 = vld [vmem:[#allocation18_spill] sm:$0xff] }
 0x13d   : > { %v1022_v16 = vmul.f32 2.0, %v2496_v62  ;;  %v1021_v47 = vmul.f32 2.0, %v2497_v46  ;;  %v1024_v33 = vmul.f32 2.0, %v2498_v28  ;;  %1328 = vrcp.f32 %v2324_v3 }
 0x13e   : > { %v1082_v19 = vadd.f32 %v858_v41, %v698_v32  ;;  %v1081_v38 = vadd.f32 %v857_v30, %v697_v63  ;;  %v692_v15 = vmul.f32 0.11111111, %v684_v4  ;;  %v691_v56 = vmul.f32 0.11111111, %v683_v58  ;;  %v2499_v32 = vld [vmem:[#allocation19_spill] sm:$0xff]  ;;  %v2500_v41 = vld [vmem:[#allocation20_spill] sm:$0xff] }
 0x13f   : > { %v828_v24 = vpop.permute.xlu1 %827  ;;  %v826_v39 = vpop.permute.xlu0 %825  ;;  %v1023_v63 = vmul.f32 2.0, %v2499_v32  ;;  %v1026_v30 = vmul.f32 2.0, %v2500_v41  ;;  %1330 = vrcp.f32 %v2326_v52  ;;  %v1030_v3 = vadd.f32 0.0001, %v1022_v16 }
 0x140   : > { %v844_v61 = vadd.f32 %v828_v24, %v812_v27  ;;  %v843_v31 = vadd.f32 %v826_v39, %v811_v51  ;;  %v1090_v49 = vadd.f32 0.0009, %v1082_v19  ;;  %v1089_v48 = vadd.f32 0.0009, %v1081_v38  ;;  %v2501_v27 = vld [vmem:[#allocation21_spill] sm:$0xff] }
 0x141   : > { %v700_v21 = vsub.f32 %v692_v15, %v2288_v2  ;;  %v699_v6 = vsub.f32 %v691_v56, %v2265_v57  ;;  %v1025_v51 = vmul.f32 2.0, %v2501_v27  ;;  %v2503_v38 = vld [vmem:[#allocation9_spill] sm:$0xff]  ;;  %v1029_v56 = vadd.f32 0.0001, %v1021_v47 }
 0x142   : > { %v852_v35 = vmul.f32 0.11111111, %v844_v61  ;;  %v851_v10 = vmul.f32 0.11111111, %v843_v31  ;;  %v1098_v60 = vmul.f32 %v1090_v49, %v1074_v36  ;;  %v1097_v18 = vmul.f32 %v1089_v48, %v1073_v54  ;;  %v2502_v36 = vld [vmem:[#allocation13_spill] sm:$0xff] }
 0x143   : > { %v944_v45 = vpop.permute.xlu1 %943  ;;  %v942_v1 = vpop.permute.xlu0 %941  ;;  %v1032_v61 = vadd.f32 0.0001, %v1024_v33  ;;  %v1031_v52 = vadd.f32 0.0001, %v1023_v63 }
 0x144   : > { %v860_v34 = vsub.f32 %v852_v35, %v2294_v37  ;;  %v859_v25 = vsub.f32 %v851_v10, %v2269_v12  ;;  %v2494_v12 = vld [vmem:[#allocation12_spill] sm:$0xff]  ;;  %v965_v14 = vadd.f32 %v942_v1, %v2495_v23  ;;  %1332 = vrcp.f32 %v1098_v60 }
 0x145   : > { %v966_v37 = vadd.f32 %v944_v45, %v2494_v12  ;;  %v2365_v45 = vadd.f32 0.0001, %v1026_v30  ;;  %v2367_v1 = vadd.f32 0.0001, %v1025_v51  ;;  %1334 = vrcp.f32 %v1097_v18 }
 0x146   : > { %v1084_v17 = vadd.f32 %v860_v34, %v700_v21  ;;  %v1083_v43 = vadd.f32 %v859_v25, %v699_v6  ;;  %v1325_v21 = vpop.eup %1324 }
 0x147   : > { %v948_v11 = vpop.permute.xlu1 %947  ;;  %v946_v29 = vpop.permute.xlu0 %945 }
 0x148   : > { %v1092_v9 = vadd.f32 0.0009, %v1084_v17  ;;  %v1091_v5 = vadd.f32 0.0009, %v1083_v43  ;;  %v968_v19 = vadd.f32 %v948_v11, %v2502_v36  ;;  %v967_v24 = vadd.f32 %v946_v29, %v2503_v38  ;;  %v1327_v60 = vpop.eup %1326  ;;  %v2504_v43 = vld [vmem:[#allocation22_spill] sm:$0xff] }
 0x149   : > { %v2370_v13 = vmul.f32 2.0, %v2504_v43  ;;  %v2506_v29 = vld [vmem:[#allocation10_spill] sm:$0xff] }
 0x14a   : > { %v1100_v42 = vmul.f32 %v1092_v9, %v1076_v53  ;;  %v2342_v7 = vmul.f32 %v1091_v5, %v1075_v26  ;;  %v2505_v26 = vld [vmem:[#allocation14_spill] sm:$0xff] }
 0x14b   : > { %v952_v2 = vpop.permute.xlu1 %951  ;;  %v950_v57 = vpop.permute.xlu0 %949 }
 0x14c   : > { %1336 = vrcp.f32 %v1100_v42  ;;  %v970_v11 = vadd.f32 %v952_v2, %v2505_v26  ;;  %v969_v53 = vadd.f32 %v950_v57, %v2506_v29  ;;  %v1028_v42 = vmul.f32 2.0, %v2292_v20 }
 0x14d   : > { %1338 = vrcp.f32 %v2342_v7  ;;  %v1329_v7 = vpop.eup %1328 }
 0x14e   : > { %v1036_v29 = vadd.f32 0.0001, %v1028_v42 }
 0x14f   : > { %v976_v55 = vpop.permute.xlu1 %975  ;;  %v974_v40 = vpop.permute.xlu0 %973 }
 0x150   : > { %v998_v44 = vadd.f32 %v976_v55, %v966_v37  ;;  %v997_v59 = vadd.f32 %v974_v40, %v965_v14 }
 0x152   : > { %v1006_v22 = vmul.f32 0.11111111, %v998_v44  ;;  %v1005_v50 = vmul.f32 0.11111111, %v997_v59  ;;  %v2507_v59 = vld [vmem:[#allocation15_spill] sm:$0xff] }
 0x153   : > { %v956_v8 = vpop.permute.xlu1 %955  ;;  %v954_v0 = vpop.permute.xlu0 %953 }
 0x154   : > { %v1014_v4 = vsub.f32 %v1006_v22, %v2496_v62  ;;  %v1013_v58 = vsub.f32 %v1005_v50, %v2497_v46  ;;  %v972_v22 = vadd.f32 %v956_v8, %v2507_v59  ;;  %v2508_v50 = vld [vmem:[#allocation11_spill] sm:$0xff] }
 0x155   : > { %v971_v62 = vadd.f32 %v954_v0, %v2508_v50 }
 0x156   : > { %v1038_v39 = vmul.f32 2.0, %v1014_v4  ;;  %v1037_v15 = vmul.f32 2.0, %v1013_v58 }
 0x157   : > { %v980_v31 = vpop.permute.xlu1 %979  ;;  %v978_v54 = vpop.permute.xlu0 %977 }
 0x158   : > { %v1046_v49 = vadd.f32 0.0009, %v1038_v39  ;;  %v1045_v48 = vadd.f32 0.0009, %v1037_v15  ;;  %v1000_v35 = vadd.f32 %v980_v31, %v968_v19  ;;  %v999_v10 = vadd.f32 %v978_v54, %v967_v24  ;;  %v1331_v19 = vpop.eup %1330 }
 0x15a   : > { %v1054_v6 = vmul.f32 %v1046_v49, %v1030_v3  ;;  %v1053_v34 = vmul.f32 %v1045_v48, %v1029_v56  ;;  %v1008_v25 = vmul.f32 0.11111111, %v1000_v35  ;;  %v1007_v17 = vmul.f32 0.11111111, %v999_v10  ;;  %v1333_v56 = vpop.eup %1332 }
 0x15b   : > { %v984_v18 = vpop.permute.xlu1 %983  ;;  %v982_v9 = vpop.permute.xlu0 %981 }
 0x15c   : > { %v1104_v5 = vmul.f32 %v1327_v60, %v1054_v6  ;;  %v1102_v12 = vmul.f32 %v1325_v21, %v1053_v34  ;;  %v1016_v37 = vsub.f32 %v1008_v25, %v2498_v28  ;;  %v1015_v23 = vsub.f32 %v1007_v17, %v2499_v32 }
 0x15d   : > { %v1002_v2 = vadd.f32 %v984_v18, %v970_v11  ;;  %v1001_v57 = vadd.f32 %v982_v9, %v969_v53  ;;  %v1035_v11 = vadd.f32 0.0001, %v2370_v13 }
 0x15e   : > { %v1118_v14 = vsub.f32 1.0, %v1104_v5  ;;  %v1117_v55 = vsub.f32 1.0, %v1102_v12  ;;  %v1040_v40 = vmul.f32 2.0, %v1016_v37  ;;  %v1039_v44 = vmul.f32 2.0, %v1015_v23 }
 0x15f   : > { %v1010_v16 = vmul.f32 0.11111111, %v1002_v2  ;;  %v1009_v46 = vmul.f32 0.11111111, %v1001_v57  ;;  %v988_v47 = vpop.permute.xlu1 %987  ;;  %v986_v28 = vpop.permute.xlu0 %985 }
 0x160   : > { %v1126_v33 = vmul.f32 0.5, %v1118_v14  ;;  %v1125_v4 = vmul.f32 0.5, %v1117_v55  ;;  %v1048_v58 = vadd.f32 0.0009, %v1040_v40  ;;  %v1047_v32 = vadd.f32 0.0009, %v1039_v44 }
 0x161   : > { %v1018_v63 = vsub.f32 %v1010_v16, %v2500_v41  ;;  %v1017_v30 = vsub.f32 %v1009_v46, %v2501_v27  ;;  %v1004_v51 = vadd.f32 %v988_v47, %v972_v22  ;;  %v1003_v36 = vadd.f32 %v986_v28, %v971_v62 }
 0x162   : > { %v1134_v38 = vmax.f32 %v1126_v33, 0.0  ;;  %v1133_v8 = vmax.f32 %v1125_v4, 0.0  ;;  %v1056_v24 = vmul.f32 %v1048_v58, %v1032_v61  ;;  %v1055_v0 = vmul.f32 %v1047_v32, %v1031_v52  ;;  %v1335_v52 = vpop.eup %1334 }
 0x163   : > { %v1042_v39 = vmul.f32 2.0, %v1018_v63  ;;  %v1041_v15 = vmul.f32 2.0, %v1017_v30  ;;  %v1012_v3 = vmul.f32 0.11111111, %v1004_v51  ;;  %v1011_v41 = vmul.f32 0.11111111, %v1003_v36  ;;  %v1337_v26 = vpop.eup %1336 }
 0x164   : > { %v1142_v27 = vmin.f32 %v1134_v38, 1.0  ;;  %v1141_v31 = vmin.f32 %v1133_v8, 1.0  ;;  %v1108_v54 = vmul.f32 %v1329_v7, %v1056_v24  ;;  %v1106_v49 = vmul.f32 %v1331_v19, %v1055_v0  ;;  %v1339_v12 = vpop.eup %1338 }
 0x165   : > { %v1050_v48 = vadd.f32 0.0009, %v1042_v39  ;;  %v1049_v35 = vadd.f32 0.0009, %v1041_v15  ;;  %v1020_v61 = vsub.f32 %v1012_v3, %v2292_v20  ;;  %v1019_v10 = vsub.f32 %v1011_v41, %v2504_v43 }
 0x166   : > { %1152 = vst.msk [vmem:[%s2391_s30 + $0x8] sm:$0x3f] %vm1151_vm2, %v1142_v27  ;;  %v1120_v21 = vsub.f32 1.0, %v1108_v54  ;;  %v1119_v6 = vsub.f32 1.0, %v1106_v49 }
 0x167   : > { %1150 = vst.msk [vmem:[%s2391_s30] sm:$0xff] %vm1149_vm3, %v1141_v31  ;;  %v1058_v34 = vmul.f32 %v1050_v48, %v2365_v45  ;;  %v1057_v25 = vmul.f32 %v1049_v35, %v2367_v1  ;;  %v1044_v17 = vmul.f32 2.0, %v1020_v61  ;;  %v1043_v60 = vmul.f32 2.0, %v1019_v10 }
 0x168   : > { %v1128_v20 = vmul.f32 0.5, %v1120_v21  ;;  %v1127_v53 = vmul.f32 0.5, %v1119_v6 }
 0x169   : > { %v1112_v43 = vmul.f32 %v1333_v56, %v1058_v34  ;;  %v1110_v18 = vmul.f32 %v1335_v52, %v1057_v25  ;;  %v1052_v9 = vadd.f32 0.0009, %v1044_v17  ;;  %v1051_v5 = vadd.f32 0.0009, %v1043_v60 }
 0x16a   : > { %v1136_v37 = vmax.f32 %v1128_v20, 0.0  ;;  %v1135_v23 = vmax.f32 %v1127_v53, 0.0 }
 0x16b   : > { %v1122_v45 = vsub.f32 1.0, %v1112_v43  ;;  %v1121_v2 = vsub.f32 1.0, %v1110_v18  ;;  %v1060_v1 = vmul.f32 %v1052_v9, %v1036_v29  ;;  %v1059_v57 = vmul.f32 %v1051_v5, %v1035_v11 }
 0x16c   : > { %v1144_v14 = vmin.f32 %v1136_v37, 1.0  ;;  %v1143_v55 = vmin.f32 %v1135_v23, 1.0 }
 0x16d   : > { %v1130_v13 = vmul.f32 0.5, %v1122_v45  ;;  %v1129_v42 = vmul.f32 0.5, %v1121_v2  ;;  %v1116_v40 = vmul.f32 %v1337_v26, %v1060_v1  ;;  %v1114_v44 = vmul.f32 %v1339_v12, %v1059_v57 }
 0x16e   : > { %1154 = vst.msk [vmem:[%s2391_s30 + $0x18] sm:$0x3f] %vm1151_vm2, %v1144_v14 }
 0x16f   : > { %1153 = vst.msk [vmem:[%s2391_s30 + $0x10] sm:$0xff] %vm1149_vm3, %v1143_v55  ;;  %v1138_v59 = vmax.f32 %v1130_v13, 0.0  ;;  %v1137_v22 = vmax.f32 %v1129_v42, 0.0  ;;  %v1124_v50 = vsub.f32 1.0, %v1116_v40  ;;  %v1123_v62 = vsub.f32 1.0, %v1114_v44 }
 0x171   : > { %v1146_v16 = vmin.f32 %v1138_v59, 1.0  ;;  %v1145_v46 = vmin.f32 %v1137_v22, 1.0  ;;  %v1132_v47 = vmul.f32 0.5, %v1124_v50  ;;  %v1131_v28 = vmul.f32 0.5, %v1123_v62 }
 0x173   : > { %1156 = vst.msk [vmem:[%s2391_s30 + $0x28] sm:$0x3f] %vm1151_vm2, %v1146_v16  ;;  %v1140_v33 = vmax.f32 %v1132_v47, 0.0  ;;  %v1139_v4 = vmax.f32 %v1131_v28, 0.0 }
 0x174   : > { %1155 = vst.msk [vmem:[%s2391_s30 + $0x20] sm:$0xff] %vm1149_vm3, %v1145_v46 }
 0x175   : > { %v1148_v58 = vmin.f32 %v1140_v33, 1.0  ;;  %v1147_v32 = vmin.f32 %v1139_v4, 1.0 }
 0x177   : > { %1158 = vst.msk [vmem:[%s2391_s30 + $0x38] sm:$0x3f] %vm1151_vm2, %v1148_v58 }
 0x178   : > { %1157 = vst.msk [vmem:[%s2391_s30 + $0x30] sm:$0xff] %vm1149_vm3, %v1147_v32 }
 0x179 PF: > { %p15_p11 = scmp.ge.s32.totalorder %s1477_s14, 4   ;;  %s2509_s9 = smov %s1426_s10 }
 0x17a   : > { %s2510_s10 = smov %s1430_s11  ;;  %s2511_s11 = smov %s1487_s17 }
 0x17b   : > { %s2512_s12 = smov %s1477_s14  ;;  %17 = sbr.rel (!%p15_p11) target bundleno = 5 (0x5), region = 81 }
 0x180   :  { %1183 = vsyncpa [#allocation3], 1 }
 0x181   :  { %1185 = vsyncpa [#allocation3 + $0x1], 1 }
 0x182   :  { %1186 = vsyncpa [#allocation5], 1 }
 0x183   :  { %1188 = vsyncpa [#allocation5 + $0x1], 1 }

</bundles_post_ra>
